<compile_context>
chip_gen: v5e
topology: v5e:2x2
jax: 0.10.0
libtpu: 0.0.40
codegen_flags: <defaults>
</compile_context>

<pallas_src>
import functools

import jax
import jax.numpy as jnp
from jax.experimental import pallas as pl
from jax.experimental.pallas import tpu as pltpu


# Tap order matches weight packing: t = (oy+1)*3 + (ox+1) = ky*3 + kx.
_TAPS = tuple((oy, ox) for oy in (-1, 0, 1) for ox in (-1, 0, 1))
_CENTER = 4  # (oy, ox) == (0, 0)


# ----------------------------------------------------------------------------
# Fused kernel: [concat -> conv3x3 -> BN -> ReLU -> conv3x3 -> BN -> ReLU]
# Layout: channels on sublanes, nb images side-by-side on lanes (L = nb*H*W).
# ----------------------------------------------------------------------------
def _merge_fused_kernel(xl_ref, xh_ref, m_ref, w1_ref, w2_ref, b1_ref, b2_ref,
                        o_ref, r1_ref, r2_ref, *, H, W, nb):
    HW = H * W
    L = nb * HW
    f32 = jnp.float32
    bf16 = jnp.bfloat16

    cl = xl_ref.shape[1]
    ch = xh_ref.shape[1]
    cin = cl + ch
    cmid = w1_ref.shape[0]
    cout = w2_ref.shape[0]

    mask = m_ref[...]                                   # (9, L) f32, hoisted

    # ---- assemble the stage-1 stacked-tap operand (9*cin, L) in VMEM -------
    # Channel concat is fused: each image's low/high channels are written side
    # by side into the center-tap rows; the other 8 taps are one roll + one
    # masked multiply of that merged block each.
    base = _CENTER * cin
    for b in range(nb):
        lo = b * HW
        r1_ref[base:base + cl, lo:lo + HW] = xl_ref[b].astype(bf16)
        r1_ref[base + cl:base + cin, lo:lo + HW] = xh_ref[b].astype(bf16)
    xm = r1_ref[base:base + cin, :].astype(f32)         # merged (cin, L)

    for t, (oy, ox) in enumerate(_TAPS):
        if t == _CENTER:
            continue
        s = oy * W + ox
        # result[:, p] = xm[:, p + s]; out-of-image positions zeroed by mask
        # (this also kills any cross-image / wraparound reads).
        xt = pltpu.roll(xm, shift=(-s) % L, axis=1)
        r1_ref[t * cin:(t + 1) * cin, :] = (xt * mask[t:t + 1, :]).astype(bf16)

    # ---- stage 1: single K = 9*cin matmul + folded-BN bias + ReLU ----------
    acc = jnp.dot(w1_ref[...], r1_ref[...], preferred_element_type=f32)
    h = jnp.maximum(acc + b1_ref[...], 0.0)             # (cmid, L) f32, on-chip

    # ---- assemble the stage-2 stacked-tap operand (9*cmid, L) --------------
    r2_ref[_CENTER * cmid:(_CENTER + 1) * cmid, :] = h.astype(bf16)
    for t, (oy, ox) in enumerate(_TAPS):
        if t == _CENTER:
            continue
        s = oy * W + ox
        xt = pltpu.roll(h, shift=(-s) % L, axis=1)
        r2_ref[t * cmid:(t + 1) * cmid, :] = (xt * mask[t:t + 1, :]).astype(bf16)

    # ---- stage 2: single K = 9*cmid matmul + folded-BN bias + ReLU ---------
    acc = jnp.dot(w2_ref[...], r2_ref[...], preferred_element_type=f32)
    out = jnp.maximum(acc + b2_ref[...], 0.0)           # (cout, L) f32

    # Lane-dense per-image stores straight into NCHW-flattened output.
    for b in range(nb):
        o_ref[b] = out[:, b * HW:(b + 1) * HW].astype(o_ref.dtype)


def _pick_batch_block(N, HW, lane_target=1024):
    """Images folded per grid step: wide lanes, but keep >=2 steps (v7x TCs)."""
    divisors = [d for d in range(1, N + 1) if N % d == 0]
    nb = max([d for d in divisors if d * HW <= lane_target] or [1])
    if N > 1 and N // nb < 2:
        nb = max([d for d in divisors if N // d >= 2] or [nb])
    return nb


def make_tap_masks(H, W, nb):
    """(9, nb*H*W) f32 {0,1} border masks (tap valid inside the image)."""
    pos = jnp.arange(H * W)
    row, col = pos // W, pos % W
    ms = []
    for oy, ox in _TAPS:
        valid = ((row + oy >= 0) & (row + oy < H) &
                 (col + ox >= 0) & (col + ox < W))
        ms.append(valid)
    m = jnp.stack(ms, 0).astype(jnp.float32)            # (9, HW)
    return jnp.tile(m, (1, nb))                         # (9, nb*HW)


def merge_conv_stack(xl, xh, masks, params, H, W, nb):
    """xl: (N, Cl, H*W) any float; xh: (N, Ch, H*W) bf16 -> (N, Cout, H*W) f32."""
    N, cl, HW = xl.shape
    ch = xh.shape[1]
    cin = cl + ch
    w1, w2, b1, b2 = params["w1"], params["w2"], params["b1"], params["b2"]
    cmid, cout = w1.shape[0], w2.shape[0]
    L = nb * HW

    kernel = functools.partial(_merge_fused_kernel, H=H, W=W, nb=nb)
    return pl.pallas_call(
        kernel,
        out_shape=jax.ShapeDtypeStruct((N, cout, HW), jnp.float32),
        grid=(N // nb,),
        in_specs=[
            pl.BlockSpec((nb, cl, HW), lambda i: (i, 0, 0)),
            pl.BlockSpec((nb, ch, HW), lambda i: (i, 0, 0)),
            pl.BlockSpec((9, L), lambda i: (0, 0)),
            pl.BlockSpec((cmid, 9 * cin), lambda i: (0, 0)),
            pl.BlockSpec((cout, 9 * cmid), lambda i: (0, 0)),
            pl.BlockSpec((cmid, 1), lambda i: (0, 0)),
            pl.BlockSpec((cout, 1), lambda i: (0, 0)),
        ],
        out_specs=pl.BlockSpec((nb, cout, HW), lambda i: (i, 0, 0)),
        scratch_shapes=[
            pltpu.VMEM((9 * cin, L), jnp.bfloat16),      # stage-1 stacked taps
            pltpu.VMEM((9 * cmid, L), jnp.bfloat16),     # stage-2 stacked taps
        ],
        compiler_params=pltpu.CompilerParams(
            dimension_semantics=("parallel",)),
    )(xl, xh, masks, w1, w2, b1, b2)


# ----------------------------------------------------------------------------
# Glue: bilinear upsample, NCHW, align_corners=False (PyTorch half-pixel),
# expressed as two small interpolation matmuls (no gathers).
# ----------------------------------------------------------------------------
def _interp_matrix(out_size, in_size):
    s = in_size / out_size
    coord = (jnp.arange(out_size, dtype=jnp.float32) + 0.5) * s - 0.5
    coord = jnp.maximum(coord, 0.0)                      # PyTorch lower clamp
    i0 = jnp.minimum(jnp.floor(coord).astype(jnp.int32), in_size - 1)
    i1 = jnp.minimum(i0 + 1, in_size - 1)
    f = coord - i0.astype(jnp.float32)
    cols = jnp.arange(in_size)
    m = ((cols[None, :] == i0[:, None]).astype(jnp.float32) * (1.0 - f)[:, None]
         + (cols[None, :] == i1[:, None]).astype(jnp.float32) * f[:, None])
    return m                                             # (out, in)


def bilinear_upsample_nchw(x, scale_factor):
    N, C, H, W = x.shape
    Ho, Wo = int(H * scale_factor), int(W * scale_factor)
    A = _interp_matrix(Ho, H)
    B = _interp_matrix(Wo, W)
    return jnp.einsum("nchw,Hh,Ww->ncHW", x, A, B)


# ----------------------------------------------------------------------------
# Merge forward (NCHW, matching the PyTorch module)
# ----------------------------------------------------------------------------
def merge_forward(x_low, x_high, params, scale_factor, nb=None):
    """x_low: (N, cin_low, H, W); x_high: (N, cin_high, H/s, W/s)."""
    N, cl, H, W = x_low.shape
    HW = H * W
    x_high_up = bilinear_upsample_nchw(x_high, scale_factor).astype(jnp.bfloat16)
    # F.dropout(p=0.2): identity in eval mode.  TODO(synk): training-mode path.
    if nb is None:
        nb = _pick_batch_block(N, HW)
    xl = x_low.reshape(N, cl, HW)
    xh = x_high_up.reshape(N, x_high_up.shape[1], HW)
    masks = make_tap_masks(H, W, nb)
    out = merge_conv_stack(xl, xh, masks, params, H, W, nb)
    return out.reshape(N, out.shape[1], H, W)


# ----------------------------------------------------------------------------
# Parameter construction: raw (PyTorch-layout) params -> kernel-ready params.
# ----------------------------------------------------------------------------
def fold_bn(gamma, beta, mean, var, eps=1e-5):
    scale = gamma / jnp.sqrt(var + eps)
    bias = beta - mean * scale
    return scale, bias


def init_raw_params(key, cin_low, cin_high, cout):
    cin = cin_low + cin_high
    cmid = cin // 2
    k = jax.random.split(key, 10)
    return {
        "w1": jax.random.normal(k[0], (cmid, cin, 3, 3), jnp.float32) * 0.1,  # OIHW
        "w2": jax.random.normal(k[1], (cout, cmid, 3, 3), jnp.float32) * 0.1,
        "g1": 1.0 + 0.1 * jax.random.normal(k[2], (cmid,), jnp.float32),
        "b1": 0.1 * jax.random.normal(k[3], (cmid,), jnp.float32),
        "m1": 0.1 * jax.random.normal(k[4], (cmid,), jnp.float32),
        "v1": jnp.abs(1.0 + 0.1 * jax.random.normal(k[5], (cmid,), jnp.float32)),
        "g2": 1.0 + 0.1 * jax.random.normal(k[6], (cout,), jnp.float32),
        "b2": 0.1 * jax.random.normal(k[7], (cout,), jnp.float32),
        "m2": 0.1 * jax.random.normal(k[8], (cout,), jnp.float32),
        "v2": jnp.abs(1.0 + 0.1 * jax.random.normal(k[9], (cout,), jnp.float32)),
    }


def prepare_params(raw, eps=1e-5):
    """Fold BN scale into the conv weights and repack each conv as a single
    lane-contiguous (Cout, 9*Cin) bf16 matrix (column = (ky*3+kx)*Cin + ci),
    matching the tap-major / channel-minor stacked operand built in-kernel.
    Biases (folded BN shift) stay in f32."""
    s1, bb1 = fold_bn(raw["g1"], raw["b1"], raw["m1"], raw["v1"], eps)
    s2, bb2 = fold_bn(raw["g2"], raw["b2"], raw["m2"], raw["v2"], eps)
    w1 = raw["w1"] * s1[:, None, None, None]
    w2 = raw["w2"] * s2[:, None, None, None]

    def repack(w):  # (Co, Ci, 3, 3) -> (Co, 9*Ci)
        co, ci = w.shape[:2]
        return jnp.transpose(w, (0, 2, 3, 1)).reshape(co, 9 * ci).astype(jnp.bfloat16)

    return {
        "w1": repack(w1),
        "w2": repack(w2),
        "b1": bb1.reshape(-1, 1).astype(jnp.float32),
        "b2": bb2.reshape(-1, 1).astype(jnp.float32),
    }


# ----------------------------------------------------------------------------
# Pure-JAX reference (mirrors the kernel's bf16 operand quantization).
# ----------------------------------------------------------------------------
def _reference_forward(x_low, x_high_up, params):
    f32 = jnp.float32
    xl = x_low.astype(jnp.bfloat16).astype(f32)
    xh = x_high_up.astype(jnp.bfloat16).astype(f32)
    x = jnp.concatenate([xl, xh], axis=1)

    def unpack(wp):  # (Co, 9*Ci) bf16 -> (Co, Ci, 3, 3) f32
        co, ci = wp.shape[0], wp.shape[1] // 9
        return jnp.transpose(wp.reshape(co, 3, 3, ci), (0, 3, 1, 2)).astype(f32)

    def conv_bn_relu(v, wp, b):
        y = jax.lax.conv_general_dilated(
            v, unpack(wp), window_strides=(1, 1), padding="SAME",
            dimension_numbers=("NCHW", "OIHW", "NCHW"))
        return jnp.maximum(y + b.reshape(1, -1, 1, 1), 0.0)

    h = conv_bn_relu(x, params["w1"], params["b1"])
    h = h.astype(jnp.bfloat16).astype(f32)
    return conv_bn_relu(h, params["w2"], params["b2"])


if __name__ == "__main__":
    key = jax.random.PRNGKey(0)
    k_low, k_high, k_p = jax.random.split(key, 3)

    # Small shapes consistent with the module (NCHW, PyTorch convention).
    N, cin_low, cin_high, cout = 2, 4, 4, 8
    H, W = 16, 16
    scale_factor = 2

    x_low = jax.random.normal(k_low, (N, cin_low, H, W), jnp.float32)
    x_high = jax.random.normal(
        k_high, (N, cin_high, H // scale_factor, W // scale_factor), jnp.float32
    )

    params = prepare_params(init_raw_params(k_p, cin_low, cin_high, cout))

    out = merge_forward(x_low, x_high, params, scale_factor)
    out = jax.block_until_ready(out)

    assert out.shape == (N, cout, H, W), out.shape
    assert bool(jnp.all(jnp.isfinite(out)))

    # Correctness vs. a pure-JAX conv reference using the same bf16 operands.
    x_high_up = bilinear_upsample_nchw(x_high, scale_factor).astype(jnp.bfloat16)
    ref = _reference_forward(x_low, x_high_up, params)
    max_err = float(jnp.max(jnp.abs(out - ref)))
    assert max_err < 2e-2, f"max abs err {max_err}"

    print("KERNEL_OK")
</pallas_src>

<mosaic_0001>
module attributes {stable_mosaic.version = 11 : i64} {
  func.func @_merge_fused_kernel(%arg0: i32, %arg1: memref<1x4x256xf32, #tpu.memory_space<vmem>>, %arg2: memref<1x4x256xbf16, #tpu.memory_space<vmem>>, %arg3: memref<9x256xf32, #tpu.memory_space<vmem>>, %arg4: memref<4x72xbf16, #tpu.memory_space<vmem>>, %arg5: memref<8x36xbf16, #tpu.memory_space<vmem>>, %arg6: memref<4x1xf32, #tpu.memory_space<vmem>>, %arg7: memref<8x1xf32, #tpu.memory_space<vmem>>, %arg8: memref<1x8x256xf32, #tpu.memory_space<vmem>>, %arg9: memref<72x256xbf16, #tpu.memory_space<vmem>>, %arg10: memref<36x256xbf16, #tpu.memory_space<vmem>>) attributes {dimension_semantics = [#tpu.dimension_semantics<parallel>], iteration_bounds = array<i64: 2>, scalar_prefetch = 0 : i64, scratch_operands = 2 : i64, tpu.core_type = #tpu.core_type<tc>, window_params = [{transform_indices = @transform_0, window_bounds = array<i64: 1, 4, 256>}, {transform_indices = @transform_1, window_bounds = array<i64: 1, 4, 256>}, {pipeline_mode = #tpu.pipeline_mode<synchronous>, transform_indices = @transform_2, window_bounds = array<i64: 9, 256>}, {pipeline_mode = #tpu.pipeline_mode<synchronous>, transform_indices = @transform_3, window_bounds = array<i64: 4, 72>}, {pipeline_mode = #tpu.pipeline_mode<synchronous>, transform_indices = @transform_4, window_bounds = array<i64: 8, 36>}, {pipeline_mode = #tpu.pipeline_mode<synchronous>, transform_indices = @transform_5, window_bounds = array<i64: 4, 1>}, {pipeline_mode = #tpu.pipeline_mode<synchronous>, transform_indices = @transform_6, window_bounds = array<i64: 8, 1>}, {transform_indices = @transform_7, window_bounds = array<i64: 1, 8, 256>}]} {
    %c0 = arith.constant 0 : index
    %c0_0 = arith.constant 0 : index
    %0 = vector.load %arg3[%c0, %c0_0] : memref<9x256xf32, #tpu.memory_space<vmem>>, vector<9x256xf32>
    %c0_1 = arith.constant 0 : index
    %c0_2 = arith.constant 0 : index
    %c0_3 = arith.constant 0 : index
    %1 = vector.load %arg1[%c0_1, %c0_2, %c0_3] : memref<1x4x256xf32, #tpu.memory_space<vmem>>, vector<1x4x256xf32>
    %2 = vector.shape_cast %1 : vector<1x4x256xf32> to vector<4x256xf32>
    %3 = arith.truncf %2 : vector<4x256xf32> to vector<4x256xbf16>
    %c32 = arith.constant 32 : index
    %c0_4 = arith.constant 0 : index
    %4 = vector.load %arg9[%c32, %c0_4] : memref<72x256xbf16, #tpu.memory_space<vmem>>, vector<4x256xbf16>
    tpu.vector_store %arg9[%c32, %c0_4], %3 {strides = array<i32>} : memref<72x256xbf16, #tpu.memory_space<vmem>>, vector<4x256xbf16>,
    %c0_5 = arith.constant 0 : index
    %c0_6 = arith.constant 0 : index
    %c0_7 = arith.constant 0 : index
    %5 = vector.load %arg2[%c0_5, %c0_6, %c0_7] : memref<1x4x256xbf16, #tpu.memory_space<vmem>>, vector<1x4x256xbf16>
    %6 = vector.shape_cast %5 : vector<1x4x256xbf16> to vector<4x256xbf16>
    %c36 = arith.constant 36 : index
    %c0_8 = arith.constant 0 : index
    %7 = vector.load %arg9[%c36, %c0_8] : memref<72x256xbf16, #tpu.memory_space<vmem>>, vector<4x256xbf16>
    tpu.vector_store %arg9[%c36, %c0_8], %6 {strides = array<i32>} : memref<72x256xbf16, #tpu.memory_space<vmem>>, vector<4x256xbf16>,
    %c32_9 = arith.constant 32 : index
    %c0_10 = arith.constant 0 : index
    %8 = vector.load %arg9[%c32_9, %c0_10] : memref<72x256xbf16, #tpu.memory_space<vmem>>, vector<8x256xbf16>
    %9 = arith.extf %8 : vector<8x256xbf16> to vector<8x256xf32>
    %c17_i32 = arith.constant 17 : i32
    %10 = tpu.dynamic_rotate %9 by %c17_i32 dim 1 : vector<8x256xf32>, i32 -> vector<8x256xf32>
    %11 = vector.extract_strided_slice %0 {offsets = [0, 0], sizes = [1, 256], strides = [1, 1]} : vector<9x256xf32> to vector<1x256xf32>
    %12 = vector.broadcast %11 : vector<1x256xf32> to vector<8x256xf32>
    %13 = arith.mulf %10, %12 : vector<8x256xf32>
    %14 = arith.truncf %13 : vector<8x256xf32> to vector<8x256xbf16>
    %c0_11 = arith.constant 0 : index
    %c0_12 = arith.constant 0 : index
    %15 = vector.load %arg9[%c0_11, %c0_12] : memref<72x256xbf16, #tpu.memory_space<vmem>>, vector<8x256xbf16>
    tpu.vector_store %arg9[%c0_11, %c0_12], %14 {strides = array<i32>} : memref<72x256xbf16, #tpu.memory_space<vmem>>, vector<8x256xbf16>,
    %c16_i32 = arith.constant 16 : i32
    %16 = tpu.dynamic_rotate %9 by %c16_i32 dim 1 : vector<8x256xf32>, i32 -> vector<8x256xf32>
    %17 = vector.extract_strided_slice %0 {offsets = [1, 0], sizes = [1, 256], strides = [1, 1]} : vector<9x256xf32> to vector<1x256xf32>
    %18 = vector.broadcast %17 : vector<1x256xf32> to vector<8x256xf32>
    %19 = arith.mulf %16, %18 : vector<8x256xf32>
    %20 = arith.truncf %19 : vector<8x256xf32> to vector<8x256xbf16>
    %c8 = arith.constant 8 : index
    %c0_13 = arith.constant 0 : index
    %21 = vector.load %arg9[%c8, %c0_13] : memref<72x256xbf16, #tpu.memory_space<vmem>>, vector<8x256xbf16>
    tpu.vector_store %arg9[%c8, %c0_13], %20 {strides = array<i32>} : memref<72x256xbf16, #tpu.memory_space<vmem>>, vector<8x256xbf16>,
    %c15_i32 = arith.constant 15 : i32
    %22 = tpu.dynamic_rotate %9 by %c15_i32 dim 1 : vector<8x256xf32>, i32 -> vector<8x256xf32>
    %23 = vector.extract_strided_slice %0 {offsets = [2, 0], sizes = [1, 256], strides = [1, 1]} : vector<9x256xf32> to vector<1x256xf32>
    %24 = vector.broadcast %23 : vector<1x256xf32> to vector<8x256xf32>
    %25 = arith.mulf %22, %24 : vector<8x256xf32>
    %26 = arith.truncf %25 : vector<8x256xf32> to vector<8x256xbf16>
    %c16 = arith.constant 16 : index
    %c0_14 = arith.constant 0 : index
    %27 = vector.load %arg9[%c16, %c0_14] : memref<72x256xbf16, #tpu.memory_space<vmem>>, vector<8x256xbf16>
    tpu.vector_store %arg9[%c16, %c0_14], %26 {strides = array<i32>} : memref<72x256xbf16, #tpu.memory_space<vmem>>, vector<8x256xbf16>,
    %c1_i32 = arith.constant 1 : i32
    %28 = tpu.dynamic_rotate %9 by %c1_i32 dim 1 : vector<8x256xf32>, i32 -> vector<8x256xf32>
    %29 = vector.extract_strided_slice %0 {offsets = [3, 0], sizes = [1, 256], strides = [1, 1]} : vector<9x256xf32> to vector<1x256xf32>
    %30 = vector.broadcast %29 : vector<1x256xf32> to vector<8x256xf32>
    %31 = arith.mulf %28, %30 : vector<8x256xf32>
    %32 = arith.truncf %31 : vector<8x256xf32> to vector<8x256xbf16>
    %c24 = arith.constant 24 : index
    %c0_15 = arith.constant 0 : index
    %33 = vector.load %arg9[%c24, %c0_15] : memref<72x256xbf16, #tpu.memory_space<vmem>>, vector<8x256xbf16>
    tpu.vector_store %arg9[%c24, %c0_15], %32 {strides = array<i32>} : memref<72x256xbf16, #tpu.memory_space<vmem>>, vector<8x256xbf16>,
    %c255_i32 = arith.constant 255 : i32
    %34 = tpu.dynamic_rotate %9 by %c255_i32 dim 1 : vector<8x256xf32>, i32 -> vector<8x256xf32>
    %35 = vector.extract_strided_slice %0 {offsets = [5, 0], sizes = [1, 256], strides = [1, 1]} : vector<9x256xf32> to vector<1x256xf32>
    %36 = vector.broadcast %35 : vector<1x256xf32> to vector<8x256xf32>
    %37 = arith.mulf %34, %36 : vector<8x256xf32>
    %38 = arith.truncf %37 : vector<8x256xf32> to vector<8x256xbf16>
    %c40 = arith.constant 40 : index
    %c0_16 = arith.constant 0 : index
    %39 = vector.load %arg9[%c40, %c0_16] : memref<72x256xbf16, #tpu.memory_space<vmem>>, vector<8x256xbf16>
    tpu.vector_store %arg9[%c40, %c0_16], %38 {strides = array<i32>} : memref<72x256xbf16, #tpu.memory_space<vmem>>, vector<8x256xbf16>,
    %c241_i32 = arith.constant 241 : i32
    %40 = tpu.dynamic_rotate %9 by %c241_i32 dim 1 : vector<8x256xf32>, i32 -> vector<8x256xf32>
    %41 = vector.extract_strided_slice %0 {offsets = [6, 0], sizes = [1, 256], strides = [1, 1]} : vector<9x256xf32> to vector<1x256xf32>
    %42 = vector.broadcast %41 : vector<1x256xf32> to vector<8x256xf32>
    %43 = arith.mulf %40, %42 : vector<8x256xf32>
    %44 = arith.truncf %43 : vector<8x256xf32> to vector<8x256xbf16>
    %c48 = arith.constant 48 : index
    %c0_17 = arith.constant 0 : index
    %45 = vector.load %arg9[%c48, %c0_17] : memref<72x256xbf16, #tpu.memory_space<vmem>>, vector<8x256xbf16>
    tpu.vector_store %arg9[%c48, %c0_17], %44 {strides = array<i32>} : memref<72x256xbf16, #tpu.memory_space<vmem>>, vector<8x256xbf16>,
    %c240_i32 = arith.constant 240 : i32
    %46 = tpu.dynamic_rotate %9 by %c240_i32 dim 1 : vector<8x256xf32>, i32 -> vector<8x256xf32>
    %47 = vector.extract_strided_slice %0 {offsets = [7, 0], sizes = [1, 256], strides = [1, 1]} : vector<9x256xf32> to vector<1x256xf32>
    %48 = vector.broadcast %47 : vector<1x256xf32> to vector<8x256xf32>
    %49 = arith.mulf %46, %48 : vector<8x256xf32>
    %50 = arith.truncf %49 : vector<8x256xf32> to vector<8x256xbf16>
    %c56 = arith.constant 56 : index
    %c0_18 = arith.constant 0 : index
    %51 = vector.load %arg9[%c56, %c0_18] : memref<72x256xbf16, #tpu.memory_space<vmem>>, vector<8x256xbf16>
    tpu.vector_store %arg9[%c56, %c0_18], %50 {strides = array<i32>} : memref<72x256xbf16, #tpu.memory_space<vmem>>, vector<8x256xbf16>,
    %c239_i32 = arith.constant 239 : i32
    %52 = tpu.dynamic_rotate %9 by %c239_i32 dim 1 : vector<8x256xf32>, i32 -> vector<8x256xf32>
    %53 = vector.extract_strided_slice %0 {offsets = [8, 0], sizes = [1, 256], strides = [1, 1]} : vector<9x256xf32> to vector<1x256xf32>
    %54 = vector.broadcast %53 : vector<1x256xf32> to vector<8x256xf32>
    %55 = arith.mulf %52, %54 : vector<8x256xf32>
    %56 = arith.truncf %55 : vector<8x256xf32> to vector<8x256xbf16>
    %c64 = arith.constant 64 : index
    %c0_19 = arith.constant 0 : index
    %57 = vector.load %arg9[%c64, %c0_19] : memref<72x256xbf16, #tpu.memory_space<vmem>>, vector<8x256xbf16>
    tpu.vector_store %arg9[%c64, %c0_19], %56 {strides = array<i32>} : memref<72x256xbf16, #tpu.memory_space<vmem>>, vector<8x256xbf16>,
    %c0_20 = arith.constant 0 : index
    %c0_21 = arith.constant 0 : index
    %58 = vector.load %arg4[%c0_20, %c0_21] : memref<4x72xbf16, #tpu.memory_space<vmem>>, vector<4x72xbf16>
    %c0_22 = arith.constant 0 : index
    %c0_23 = arith.constant 0 : index
    %59 = vector.load %arg9[%c0_22, %c0_23] : memref<72x256xbf16, #tpu.memory_space<vmem>>, vector<72x256xbf16>
    %cst = arith.constant dense<0.000000e+00> : vector<4x256xf32>
    %60 = tpu.matmul %58, %59, %cst {dimension_numbers = #tpu.dot_dimension_numbers<[1], [0], [0], [1], [0, 0, 1, 1], [], []>} : vector<4x72xbf16>, vector<72x256xbf16>, vector<4x256xf32> -> vector<4x256xf32>
    %c0_24 = arith.constant 0 : index
    %c0_25 = arith.constant 0 : index
    %61 = vector.load %arg6[%c0_24, %c0_25] : memref<4x1xf32, #tpu.memory_space<vmem>>, vector<4x1xf32>
    %62 = vector.broadcast %61 : vector<4x1xf32> to vector<4x256xf32>
    %63 = arith.addf %60, %62 : vector<4x256xf32>
    %cst_26 = arith.constant 0.000000e+00 : f32
    %64 = vector.broadcast %cst_26 : f32 to vector<4x256xf32>
    %65 = arith.maximumf %63, %64 : vector<4x256xf32>
    %66 = arith.truncf %65 : vector<4x256xf32> to vector<4x256xbf16>
    %c16_27 = arith.constant 16 : index
    %c0_28 = arith.constant 0 : index
    %67 = vector.load %arg10[%c16_27, %c0_28] : memref<36x256xbf16, #tpu.memory_space<vmem>>, vector<4x256xbf16>
    tpu.vector_store %arg10[%c16_27, %c0_28], %66 {strides = array<i32>} : memref<36x256xbf16, #tpu.memory_space<vmem>>, vector<4x256xbf16>,
    %c17_i32_29 = arith.constant 17 : i32
    %68 = tpu.dynamic_rotate %65 by %c17_i32_29 dim 1 : vector<4x256xf32>, i32 -> vector<4x256xf32>
    %69 = vector.extract_strided_slice %0 {offsets = [0, 0], sizes = [1, 256], strides = [1, 1]} : vector<9x256xf32> to vector<1x256xf32>
    %70 = vector.broadcast %69 : vector<1x256xf32> to vector<4x256xf32>
    %71 = arith.mulf %68, %70 : vector<4x256xf32>
    %72 = arith.truncf %71 : vector<4x256xf32> to vector<4x256xbf16>
    %c0_30 = arith.constant 0 : index
    %c0_31 = arith.constant 0 : index
    %73 = vector.load %arg10[%c0_30, %c0_31] : memref<36x256xbf16, #tpu.memory_space<vmem>>, vector<4x256xbf16>
    tpu.vector_store %arg10[%c0_30, %c0_31], %72 {strides = array<i32>} : memref<36x256xbf16, #tpu.memory_space<vmem>>, vector<4x256xbf16>,
    %c16_i32_32 = arith.constant 16 : i32
    %74 = tpu.dynamic_rotate %65 by %c16_i32_32 dim 1 : vector<4x256xf32>, i32 -> vector<4x256xf32>
    %75 = vector.extract_strided_slice %0 {offsets = [1, 0], sizes = [1, 256], strides = [1, 1]} : vector<9x256xf32> to vector<1x256xf32>
    %76 = vector.broadcast %75 : vector<1x256xf32> to vector<4x256xf32>
    %77 = arith.mulf %74, %76 : vector<4x256xf32>
    %78 = arith.truncf %77 : vector<4x256xf32> to vector<4x256xbf16>
    %c4 = arith.constant 4 : index
    %c0_33 = arith.constant 0 : index
    %79 = vector.load %arg10[%c4, %c0_33] : memref<36x256xbf16, #tpu.memory_space<vmem>>, vector<4x256xbf16>
    tpu.vector_store %arg10[%c4, %c0_33], %78 {strides = array<i32>} : memref<36x256xbf16, #tpu.memory_space<vmem>>, vector<4x256xbf16>,
    %c15_i32_34 = arith.constant 15 : i32
    %80 = tpu.dynamic_rotate %65 by %c15_i32_34 dim 1 : vector<4x256xf32>, i32 -> vector<4x256xf32>
    %81 = vector.extract_strided_slice %0 {offsets = [2, 0], sizes = [1, 256], strides = [1, 1]} : vector<9x256xf32> to vector<1x256xf32>
    %82 = vector.broadcast %81 : vector<1x256xf32> to vector<4x256xf32>
    %83 = arith.mulf %80, %82 : vector<4x256xf32>
    %84 = arith.truncf %83 : vector<4x256xf32> to vector<4x256xbf16>
    %c8_35 = arith.constant 8 : index
    %c0_36 = arith.constant 0 : index
    %85 = vector.load %arg10[%c8_35, %c0_36] : memref<36x256xbf16, #tpu.memory_space<vmem>>, vector<4x256xbf16>
    tpu.vector_store %arg10[%c8_35, %c0_36], %84 {strides = array<i32>} : memref<36x256xbf16, #tpu.memory_space<vmem>>, vector<4x256xbf16>,
    %c1_i32_37 = arith.constant 1 : i32
    %86 = tpu.dynamic_rotate %65 by %c1_i32_37 dim 1 : vector<4x256xf32>, i32 -> vector<4x256xf32>
    %87 = vector.extract_strided_slice %0 {offsets = [3, 0], sizes = [1, 256], strides = [1, 1]} : vector<9x256xf32> to vector<1x256xf32>
    %88 = vector.broadcast %87 : vector<1x256xf32> to vector<4x256xf32>
    %89 = arith.mulf %86, %88 : vector<4x256xf32>
    %90 = arith.truncf %89 : vector<4x256xf32> to vector<4x256xbf16>
    %c12 = arith.constant 12 : index
    %c0_38 = arith.constant 0 : index
    %91 = vector.load %arg10[%c12, %c0_38] : memref<36x256xbf16, #tpu.memory_space<vmem>>, vector<4x256xbf16>
    tpu.vector_store %arg10[%c12, %c0_38], %90 {strides = array<i32>} : memref<36x256xbf16, #tpu.memory_space<vmem>>, vector<4x256xbf16>,
    %c255_i32_39 = arith.constant 255 : i32
    %92 = tpu.dynamic_rotate %65 by %c255_i32_39 dim 1 : vector<4x256xf32>, i32 -> vector<4x256xf32>
    %93 = vector.extract_strided_slice %0 {offsets = [5, 0], sizes = [1, 256], strides = [1, 1]} : vector<9x256xf32> to vector<1x256xf32>
    %94 = vector.broadcast %93 : vector<1x256xf32> to vector<4x256xf32>
    %95 = arith.mulf %92, %94 : vector<4x256xf32>
    %96 = arith.truncf %95 : vector<4x256xf32> to vector<4x256xbf16>
    %c20 = arith.constant 20 : index
    %c0_40 = arith.constant 0 : index
    %97 = vector.load %arg10[%c20, %c0_40] : memref<36x256xbf16, #tpu.memory_space<vmem>>, vector<4x256xbf16>
    tpu.vector_store %arg10[%c20, %c0_40], %96 {strides = array<i32>} : memref<36x256xbf16, #tpu.memory_space<vmem>>, vector<4x256xbf16>,
    %c241_i32_41 = arith.constant 241 : i32
    %98 = tpu.dynamic_rotate %65 by %c241_i32_41 dim 1 : vector<4x256xf32>, i32 -> vector<4x256xf32>
    %99 = vector.extract_strided_slice %0 {offsets = [6, 0], sizes = [1, 256], strides = [1, 1]} : vector<9x256xf32> to vector<1x256xf32>
    %100 = vector.broadcast %99 : vector<1x256xf32> to vector<4x256xf32>
    %101 = arith.mulf %98, %100 : vector<4x256xf32>
    %102 = arith.truncf %101 : vector<4x256xf32> to vector<4x256xbf16>
    %c24_42 = arith.constant 24 : index
    %c0_43 = arith.constant 0 : index
    %103 = vector.load %arg10[%c24_42, %c0_43] : memref<36x256xbf16, #tpu.memory_space<vmem>>, vector<4x256xbf16>
    tpu.vector_store %arg10[%c24_42, %c0_43], %102 {strides = array<i32>} : memref<36x256xbf16, #tpu.memory_space<vmem>>, vector<4x256xbf16>,
    %c240_i32_44 = arith.constant 240 : i32
    %104 = tpu.dynamic_rotate %65 by %c240_i32_44 dim 1 : vector<4x256xf32>, i32 -> vector<4x256xf32>
    %105 = vector.extract_strided_slice %0 {offsets = [7, 0], sizes = [1, 256], strides = [1, 1]} : vector<9x256xf32> to vector<1x256xf32>
    %106 = vector.broadcast %105 : vector<1x256xf32> to vector<4x256xf32>
    %107 = arith.mulf %104, %106 : vector<4x256xf32>
    %108 = arith.truncf %107 : vector<4x256xf32> to vector<4x256xbf16>
    %c28 = arith.constant 28 : index
    %c0_45 = arith.constant 0 : index
    %109 = vector.load %arg10[%c28, %c0_45] : memref<36x256xbf16, #tpu.memory_space<vmem>>, vector<4x256xbf16>
    tpu.vector_store %arg10[%c28, %c0_45], %108 {strides = array<i32>} : memref<36x256xbf16, #tpu.memory_space<vmem>>, vector<4x256xbf16>,
    %c239_i32_46 = arith.constant 239 : i32
    %110 = tpu.dynamic_rotate %65 by %c239_i32_46 dim 1 : vector<4x256xf32>, i32 -> vector<4x256xf32>
    %111 = vector.extract_strided_slice %0 {offsets = [8, 0], sizes = [1, 256], strides = [1, 1]} : vector<9x256xf32> to vector<1x256xf32>
    %112 = vector.broadcast %111 : vector<1x256xf32> to vector<4x256xf32>
    %113 = arith.mulf %110, %112 : vector<4x256xf32>
    %114 = arith.truncf %113 : vector<4x256xf32> to vector<4x256xbf16>
    %c32_47 = arith.constant 32 : index
    %c0_48 = arith.constant 0 : index
    %115 = vector.load %arg10[%c32_47, %c0_48] : memref<36x256xbf16, #tpu.memory_space<vmem>>, vector<4x256xbf16>
    tpu.vector_store %arg10[%c32_47, %c0_48], %114 {strides = array<i32>} : memref<36x256xbf16, #tpu.memory_space<vmem>>, vector<4x256xbf16>,
    %c0_49 = arith.constant 0 : index
    %c0_50 = arith.constant 0 : index
    %116 = vector.load %arg5[%c0_49, %c0_50] : memref<8x36xbf16, #tpu.memory_space<vmem>>, vector<8x36xbf16>
    %c0_51 = arith.constant 0 : index
    %c0_52 = arith.constant 0 : index
    %117 = vector.load %arg10[%c0_51, %c0_52] : memref<36x256xbf16, #tpu.memory_space<vmem>>, vector<36x256xbf16>
    %cst_53 = arith.constant dense<0.000000e+00> : vector<8x256xf32>
    %118 = tpu.matmul %116, %117, %cst_53 {dimension_numbers = #tpu.dot_dimension_numbers<[1], [0], [0], [1], [0, 0, 1, 1], [], []>} : vector<8x36xbf16>, vector<36x256xbf16>, vector<8x256xf32> -> vector<8x256xf32>
    %c0_54 = arith.constant 0 : index
    %c0_55 = arith.constant 0 : index
    %119 = vector.load %arg7[%c0_54, %c0_55] : memref<8x1xf32, #tpu.memory_space<vmem>>, vector<8x1xf32>
    %120 = vector.broadcast %119 : vector<8x1xf32> to vector<8x256xf32>
    %121 = arith.addf %118, %120 : vector<8x256xf32>
    %cst_56 = arith.constant 0.000000e+00 : f32
    %122 = vector.broadcast %cst_56 : f32 to vector<8x256xf32>
    %123 = arith.maximumf %121, %122 : vector<8x256xf32>
    %c0_57 = arith.constant 0 : index
    %c0_58 = arith.constant 0 : index
    %c0_59 = arith.constant 0 : index
    %124 = vector.load %arg8[%c0_57, %c0_58, %c0_59] : memref<1x8x256xf32, #tpu.memory_space<vmem>>, vector<1x8x256xf32>
    %125 = vector.shape_cast %124 : vector<1x8x256xf32> to vector<8x256xf32>
    %126 = vector.shape_cast %123 : vector<8x256xf32> to vector<1x8x256xf32>
    tpu.vector_store %arg8[%c0_57, %c0_58, %c0_59], %126 {strides = array<i32>} : memref<1x8x256xf32, #tpu.memory_space<vmem>>, vector<1x8x256xf32>,
    return
  }
  func.func @transform_0(%arg0: i32) -> (i32, i32, i32) {
    %c0_i32 = arith.constant 0 : i32
    %c0_i32_0 = arith.constant 0 : i32
    %c0_i32_1 = arith.constant 0 : i32
    return %arg0, %c0_i32, %c0_i32_0 : i32, i32, i32
  }
  func.func @transform_1(%arg0: i32) -> (i32, i32, i32) {
    %c0_i32 = arith.constant 0 : i32
    %c0_i32_0 = arith.constant 0 : i32
    %c0_i32_1 = arith.constant 0 : i32
    return %arg0, %c0_i32, %c0_i32_0 : i32, i32, i32
  }
  func.func @transform_2(%arg0: i32) -> (i32, i32) {
    %c0_i32 = arith.constant 0 : i32
    %c0_i32_0 = arith.constant 0 : i32
    %c0_i32_1 = arith.constant 0 : i32
    return %c0_i32, %c0_i32_0 : i32, i32
  }
  func.func @transform_3(%arg0: i32) -> (i32, i32) {
    %c0_i32 = arith.constant 0 : i32
    %c0_i32_0 = arith.constant 0 : i32
    %c0_i32_1 = arith.constant 0 : i32
    return %c0_i32, %c0_i32_0 : i32, i32
  }
  func.func @transform_4(%arg0: i32) -> (i32, i32) {
    %c0_i32 = arith.constant 0 : i32
    %c0_i32_0 = arith.constant 0 : i32
    %c0_i32_1 = arith.constant 0 : i32
    return %c0_i32, %c0_i32_0 : i32, i32
  }
  func.func @transform_5(%arg0: i32) -> (i32, i32) {
    %c0_i32 = arith.constant 0 : i32
    %c0_i32_0 = arith.constant 0 : i32
    %c0_i32_1 = arith.constant 0 : i32
    return %c0_i32, %c0_i32_0 : i32, i32
  }
  func.func @transform_6(%arg0: i32) -> (i32, i32) {
    %c0_i32 = arith.constant 0 : i32
    %c0_i32_0 = arith.constant 0 : i32
    %c0_i32_1 = arith.constant 0 : i32
    return %c0_i32, %c0_i32_0 : i32, i32
  }
  func.func @transform_7(%arg0: i32) -> (i32, i32, i32) {
    %c0_i32 = arith.constant 0 : i32
    %c0_i32_0 = arith.constant 0 : i32
    %c0_i32_1 = arith.constant 0 : i32
    return %arg0, %c0_i32, %c0_i32_0 : i32, i32, i32
  }
}

</mosaic_0001>

<bundles_post_ra>
// kernel: tpu_custom_call.1
= control target key start
LH: loop header
LB: loop body
LE: loop exit
PB: predicated region body
PF: predicated region fallthrough
CT: control target
= control target key end

     0   :  { %s1633_s0 = inlined_call_operand.hbm [shape: f32[2,4,256], index: 0, kind: input, shape index: {}]   ;;  %s1634_s1 = inlined_call_operand.vmem [shape: bf16[2,4,256], index: 1, kind: input, shape index: {}]   ;;  %s1635_s2 = inlined_call_operand.hbm [shape: f32[9,256], index: 2, kind: input, shape index: {}]   ;;  %s1636_s3 = inlined_call_operand.hbm [shape: bf16[4,72], index: 3, kind: input, shape index: {}]   ;;  %s1637_s4 = inlined_call_operand.vmem [shape: bf16[8,36], index: 4, kind: input, shape index: {}]   ;;  %s1638_s5 = inlined_call_operand.vmem [shape: f32[4,1], index: 5, kind: input, shape index: {}]   ;;  %s1639_s6 = inlined_call_operand.vmem [shape: f32[8,1], index: 6, kind: input, shape index: {}]   ;;  %s1640_s7 = inlined_call_operand.hbm [shape: f32[2,8,256], index: 7, kind: output, shape index: {}]  }
   0x1   :  { %1641 = sst [smem:[#allocation14_spill]] %s1635_s2 }
   0x2   :  { %1642 = sst [smem:[#allocation15_spill]] %s1636_s3 }
   0x3   :  { %12 = vsyncpa [#allocation5], 0 }
   0x4   :  { %14 = vsyncpa [#allocation5 + $0x1], 0 }
   0x5   :  { %15 = vsyncpa [#allocation8], 0 }
   0x6   :  { %16 = vsyncpa [#allocation6], 0 }
   0x7   :  { %18 = vsyncpa [#allocation6 + $0x1], 0  ;;  %s1293_s24 = smov 0   ;;  %s1295_s25 = smov 0  }
   0x8   :  { %s1297_s26 = smov 0   ;;  %s1299_s27 = smov 0  }
   0x9 LB: > { %s1643_s2 = sld [smem:[#allocation14_spill]]  ;;  %s1317_s8 = sadd.s32 4294967295, %s1238_s27   ;;  %s1238_s27 = sphi %s1299_s27, %s1655_s27   ;;  %s1234_s26 = sphi %s1297_s26, %s1654_s26   ;;  %s1230_s25 = sphi %s1295_s25, %s1653_s25   ;;  %s1226_s24 = sphi %s1293_s24, %s1652_s24  }
   0xa   : > { %p869_p0 = scmp.ge.s32.totalorder %s1238_s27, 1  ;;  %p45_p1 = scmp.eq.s32.totalorder %s1317_s8, 0 }
   0xb   : > { %p212_p2 = scmp.lt.s32.totalorder %s1238_s27, 3  ;;  %s1240_s10 = smov [#allocation7]  }
   0xc   : > { %s225_s11 = sshll.u32 %s1240_s10, 4  ;;  %s1645_s3 = sld [smem:[#allocation15_spill]]  ;;  %s226_s11 = int_to_ptr.vmem [resolvable:$true] %s225_s11 }
   0xd   : > { %p1322_p3 = pnand %p869_p0, %p212_p2  ;;  %s1241_s15 = smov [#allocation9]  }
   0xe   : > { %s240_s16 = sshll.u32 %s1241_s15, 4  ;;  %s1242_s17 = smov 256   ;;  %s241_s16 = int_to_ptr.vmem [resolvable:$true] %s240_s16 }
   0xf   : > { %s223_s30 = sshll.u32 %s1643_s2, 4  ;;  %p967_p4 = pneg %p1322_p3  ;;  %s224_s30 = int_to_ptr.hbm [resolvable:$true] %s223_s30 }
  0x10   : > { %s1243_s18 = smov 16   ;;  %s868_s19 = sadd.s32 4294967294, %s1238_s27  }
  0x11   : > { %p968_p6 = pnand %p967_p4, %p45_p1  ;;  %s1336_s20 = sadd.s32 1, %s1238_s27  }
  0x12   : > { %s238_s14 = sshll.u32 %s1645_s3, 4  ;;  %s28_s21 = ssub.s32 %s1238_s27, %s1336_s20  ;;  %s239_s14 = int_to_ptr.hbm [resolvable:$true] %s238_s14 }
  0x13   : > { %970 = dma.hbm_to_vmem [thread:$0]  (!%p968_p6), %s224_s30, 512, %s226_s11, [#allocation8], %s1242_s17, %s1242_s17, %s1243_s18  }
  0x14   : > { %973 = dma.hbm_to_vmem [thread:$0]  (!%p968_p6), %s239_s14, 32, %s241_s16, [#allocation8]  }
  0x15   : > { %s31_s22 = sadd.s32 1, %s1234_s26  ;;  %p29_p7 = scmp.eq.s32.totalorder %s28_s21, 0 }
  0x16   : > { %p38_p8 = scmp.ne.s32.totalorder %s1234_s26, %s1230_s25  ;;  %p39_p9 = scmp.eq.s32.totalorder %s1238_s27, 0 }
  0x17   : > { %p44_p10 = scmp.ne.s32.totalorder %s1230_s25, %s1226_s24  ;;  %p199_p13 = scmp.eq.s32.totalorder %s1317_s8, 1 }
  0x18   : > { %s1347_s23 = scalar_select %p29_p7, %s1234_s26, %s31_s22  }
  0x19   : > { %p1349_p11 = por %p39_p9, %p38_p8  ;;  %p1355_p12 = por %p45_p1, %p44_p10 }
  0x1a   : > { %p205_p0 = scmp.eq.s32.totalorder %s868_s19, 1  ;;  %p984_p2 = scmp.lt.s32.totalorder %s1238_s27, 2 }
  0x1b   : > { %s260_s30 = sand.u32 1, %s1234_s26   ;;  %p1362_p4 = por %p199_p13, %p38_p8 }
  0x1c   : > { %p1366_p6 = por %p205_p0, %p44_p10  ;;  %s873_s12 = sshll.u32 %s260_s30, 3 }
  0x1d   : > { %s940_s13 = sshll.u32 %s1238_s27, 3  ;;  %s264_s17 = scalar_lea.vmem [#allocation4], %s873_s12 }
  0x1e   : > { %s269_s16 = scalar_lea.hbm %s1633_s0, %s940_s13  ;;  %s273_s18 = sshll.u32 %s264_s17, 4  ;;  %s274_s18 = int_to_ptr.vmem [resolvable:$true] %s273_s18 }
  0x1f   : > { %s271_s21 = sshll.u32 %s269_s16, 4  ;;  %p1376_p7 = pnand %p984_p2, %p1349_p11  ;;  %s272_s21 = int_to_ptr.hbm [resolvable:$true] %s271_s21 }
  0x20   : > { %s261_s22 = scalar_lea.sflag [#allocation5], %s260_s30  ;;  %s1138_s2 = sshra.s32 %s272_s21, 4  ;;  %s1139_s2 = int_to_ptr.hbm [resolvable:$true] %s1138_s2 }
  0x21   : > { %s1140_s3 = scalar_lea.hbm %s1139_s2, 8  ;;  %p1142_p9 = pneg %p1376_p7 }
  0x22   : > { %p1141_p8 = scmp.ne.s32.totalorder %s1139_s2, %s1140_s3  ;;  %s1145_s14 = scalar_lea.hbm %s1633_s0, 16 }
  0x23   : > { %p1146_p11 = scmp.lt.s32.totalorder %s1139_s2, %s1633_s0  ;;  %p1147_p0 = scmp.lt.s32.totalorder %s1145_s14, %s1140_s3 }
  0x24   : > { %p1143_p10 = pnand %p1142_p9, %p1141_p8 }
  0x25   : > { %p1148_p2 = por %p1147_p0, %p1146_p11 }
  0x26   : > { %p1144_p13 = pneg %p1143_p10 }
  0x28   : > { %p1149_p5 = pnand %p1148_p2, %p1144_p13 }
  0x2a   : > { %1152 = shalt.err (!%p1149_p5)
}
  0x2b   : > { %977 = dma.hbm_to_vmem [thread:$0]  (!%p1376_p7), %s272_s21, 128, %s274_s18, %s261_s22  }
  0x2c   : > { %290 = sbr.rel (%p1322_p3) target bundleno = 679 (0x2a7), region = 48  ;;  %s1393_s30 = sand.u32 (!%p1322_p3), 1, %s1230_s25  }
  0x2d   : > { %s877_s16 = sshll.u32 (!%p1322_p3), %s1393_s30, 3  ;;  %s293_s17 = scalar_lea.sflag (!%p1322_p3), [#allocation5], %s1393_s30 }
  0x2e   : > { %s296_s12 = scalar_lea.vmem (!%p1322_p3), [#allocation4], %s877_s16 }
  0x31   : > { %1213 = dma.done.wait (%p1355_p12), %s293_s17, 128  }
  0x32   : > { %1215 = vsyncadd (%p1355_p12), %s293_s17, 4294967168 }
  0x33   : > { %1217 = dma.done.wait (%p45_p1), [#allocation8], 544  }
  0x34   : > { %1219 = vsyncadd (%p45_p1), [#allocation8], 4294966752  ;;  %p343_p3 = scmp.lt.s32.totalorder %s1317_s8, 1  ;;  %v353_v0 = vld [vmem:[%s296_s12] sm:$0xff]  ;;  %s1244_s29 = smov 111   ;;  %v376_v10 = vlaneseq  ;;  %v1420_v12 = vld [vmem:[#allocation7] sm:$0xff] }
  0x35   : > { %355 = vst [vmem:[#allocation1] ss:$2 sm:$0xff] %v353_v0  ;;  %s1245_s19 = smov 112   ;;  %s1246_s22 = smov 15   ;;  %v1422_v13 = vld [vmem:[#allocation7 + $0x8] sm:$0xff]  ;;  %v407_v15 = vperm.slane %v1420_v12, 2 }
  0x36   : > { %s344_s2 = scalar_select %p343_p3, %s1317_s8, 1  ;;  %v1418_v11 = vand.u32 127, %v376_v10  ;;  %v408_v16 = vperm.slane %v1422_v13, 2  ;;  %v420_v25 = vperm.slane %v1420_v12, 3  ;;  %v421_v26 = vperm.slane %v1422_v13, 3 }
  0x37   : > { %s1247_s13 = smov 113   ;;  %s1248_s14 = smov 127   ;;  %v1446_v34 = vld [vmem:[#allocation7 + $0x10] ss:$0 sm:$0xff]  ;;  %v1449_v36 = vld [vmem:[#allocation7 + $0x18] ss:$0 sm:$0xff] }
  0x38   : > { %s941_s3 = sshll.u32 %s344_s2, 2  ;;  %s1249_s15 = smov 1   ;;  %vm404_vm0 = vcmp.lt.s32.totalorder %v1418_v11, 15  ;;  %vm417_vm1 = vcmp.lt.s32.totalorder %v1418_v11, 1  ;;  %vm469_vm2 = vcmp.lt.s32.totalorder %v1418_v11, 111  ;;  %vm456_vm3 = vcmp.lt.s32.totalorder %v1418_v11, 112 }
  0x39   : > { %s347_s21 = scalar_lea.vmem %s1634_s1, %s941_s3  ;;  %s1250_s28 = smov 16   ;;  %v459_v38 = vperm.slane %v1420_v12, 7  ;;  %v460_v39 = vperm.slane %v1422_v13, 7  ;;  %vm443_vm4 = vcmp.lt.s32.totalorder %v1418_v11, 113  ;;  %v446_v54 = vperm.slane %v1420_v12, 6 }
  0x3a   : > { %v362_v1 = vld [vmem:[%s347_s21] sm:$0xf]  ;;  %s1251_s16 = smov 17   ;;  %v447_v55 = vperm.slane %v1422_v13, 6  ;;  %vm430_vm5 = vcmp.lt.s32.totalorder %v1418_v11, 127  ;;  %v433_v58 = vperm.slane %v1420_v12, 5 }
  0x3b   : > { %v434_v59 = vperm.slane %v1422_v13, 5  ;;  %vm543_vm6 = vcmask 1043456   ;;  %vm391_vm7 = vcmp.lt.s32.totalorder %v1418_v11, 16  ;;  %vm378_vm8 = vcmp.lt.s32.totalorder %v1418_v11, 17  ;;  %v672_v11 = vld [vmem:[%s1637_s4] sm:$0xf] }
  0x3c   : > { %v356_v2 = vld.sshfl [vmem:[#allocation1] sm:$0xff pattern:$0x75316420]  ;;  %v357_v3 = vld.sshfl [vmem:[#allocation1 + $0x8] sm:$0xff pattern:$0x75316420] }
  0x3d   : > { %v360_v4 = vpack.c.bf16 %v357_v3, %v356_v2  ;;  %365 = vst [vmem:[#allocation1 + $0x1] ss:$2 sm:$0xff] %v362_v1  ;;  %v488_v2 = vld [vmem:[%s1638_s5] sm:$0xf]  ;;  %vm539_vm9 = vcmask 588800   ;;  %vm713_vm10 = vcmask 1041408  }
  0x3e   : > { %vm709_vm11 = vcmask 293888   ;;  %s880_s21 = sshll.u32 %s1393_s30, 4  ;;  %s1188_s3 = scalar_lea.hbm %s1640_s7, 32 }
  0x3f   : > { %361 = vst [vmem:[#allocation2 + $0x20] sm:$0x33] %v360_v4 }
  0x44   : > { %v366_v5 = vld.sshfl [vmem:[#allocation1] sm:$0xff pattern:$0x75643120] }
  0x45   : > { %368 = vst [vmem:[#allocation2 + $0x20] sm:$0xcc] %v366_v5 }
  0x4c   : > { %v369_v6 = vld [vmem:[#allocation2 + $0x20] sm:$0xff] }
  0x4d   : > { %v370_v7 = vunpack.c.l.bf16 %v369_v6  ;;  %v371_v8 = vunpack.c.h.bf16 %v369_v6 }
  0x4f   : > { %v1033_v9 = vpack.i.bf16 %v371_v8, %v370_v7 }
  0x51   : > { %1034 = vrot.lane.b32.xlu0 %v1033_v9, %s1244_s29  ;;  %1044 = vrot.lane.b32.xlu1 %v1033_v9, %s1245_s19 }
  0x52   : > { %1054 = vrot.lane.b32.xlu2 %v1033_v9, %s1246_s22 }
  0x59   : > { %1039 = vrot.lane.b32.xlu0 %v1033_v9, %s1247_s13  ;;  %1049 = vrot.lane.b32.xlu1 %v1033_v9, %s1248_s14 }
  0x5a   : > { %1059 = vrot.lane.b32.xlu2 %v1033_v9, %s1249_s15 }
  0x61   : > { %1069 = vrot.lane.b32.xlu1 %v1033_v9, %s1250_s28  ;;  %1064 = vrot.lane.b32.xlu0 %v1033_v9, %s1251_s16  ;;  %v1252_v9 = vmov 0  }
  0x62   : > { %1073 = vset.pattern.permute.xlu2 %v1252_v9  ;;  %1074 = vset.pattern.permute.xlu1 %v1252_v9 }
  0x63   : > { %491 = vperm.xlu2 %1073, %v488_v2   ;;  %1075 = vset.pattern.permute.xlu0 %v1252_v9 }
  0xac   : > { %v1055_v14 = vpop.permute.xlu2 %1054 }
  0xad   : > { %v1057_v17 = vunpack.i.h.bf16 %v1055_v14  ;;  %v1056_v18 = vunpack.i.l.bf16 %v1055_v14 }
  0xaf   : > { %v405_v19 = vsel %vm404_vm0, %v1056_v18, %v1057_v17  ;;  %v406_v20 = vsel %vm404_vm0, %v1057_v17, %v1056_v18 }
  0xb0   : > { %v409_v21 = vmul.f32 %v407_v15, %v406_v20  ;;  %v410_v22 = vmul.f32 %v408_v16, %v405_v19 }
  0xb2   : > { %v411_v23 = vpack.c.bf16 %v410_v22, %v409_v21 }
  0xb4   : > { %412 = vst [vmem:[#allocation2 + $0x10] sm:$0xff] %v411_v23  ;;  %v1060_v24 = vpop.permute.xlu2 %1059  ;;  %v394_v23 = vperm.slane %v1420_v12, 1 }
  0xb5   : > { %v1062_v27 = vunpack.i.h.bf16 %v1060_v24  ;;  %v1061_v28 = vunpack.i.l.bf16 %v1060_v24 }
  0xb7   : > { %v418_v29 = vsel %vm417_vm1, %v1061_v28, %v1062_v27  ;;  %v419_v30 = vsel %vm417_vm1, %v1062_v27, %v1061_v28  ;;  %v395_v27 = vperm.slane %v1422_v13, 1 }
  0xb8   : > { %v422_v31 = vmul.f32 %v420_v25, %v419_v30  ;;  %v423_v32 = vmul.f32 %v421_v26, %v418_v29  ;;  %v381_v29 = vperm.slane %v1420_v12, 0  ;;  %v382_v30 = vperm.slane %v1422_v13, 0 }
  0xba   : > { %v424_v33 = vpack.c.bf16 %v423_v32, %v422_v31 }
  0xbc   : > { %425 = vst [vmem:[#allocation2 + $0x18] sm:$0xff] %v424_v33 }
  0xc3   : > { %v1035_v35 = vpop.permute.xlu0 %1034  ;;  %v1045_v37 = vpop.permute.xlu1 %1044  ;;  %v945_v2 = vld [vmem:[#allocation2 + $0x14] sm:$0xf0] }
  0xc4   : > { %v1037_v40 = vunpack.i.h.bf16 %v1035_v35  ;;  %v1036_v41 = vunpack.i.l.bf16 %v1035_v35  ;;  %v1047_v42 = vunpack.i.h.bf16 %v1045_v37  ;;  %v1046_v43 = vunpack.i.l.bf16 %v1045_v37 }
  0xc6   : > { %v470_v44 = vsel %vm469_vm2, %v1036_v41, %v1037_v40  ;;  %v471_v45 = vsel %vm469_vm2, %v1037_v40, %v1036_v41  ;;  %v457_v46 = vsel %vm456_vm3, %v1046_v43, %v1047_v42  ;;  %v458_v47 = vsel %vm456_vm3, %v1047_v42, %v1046_v43 }
  0xc7   : > { %v474_v48 = vmul.f32 %v1446_v34, %v470_v44  ;;  %v475_v49 = vmul.f32 %v1449_v36, %v471_v45  ;;  %v461_v50 = vmul.f32 %v459_v38, %v457_v46  ;;  %v462_v51 = vmul.f32 %v460_v39, %v458_v47 }
  0xc9   : > { %v476_v52 = vpack.c.bf16 %v475_v49, %v474_v48  ;;  %v463_v53 = vpack.c.bf16 %v462_v51, %v461_v50  ;;  %v901_v50 = vld [vmem:[#allocation2 + $0x20] sm:$0xf]  ;;  %v946_v51 = vld [vmem:[#allocation2 + $0x24] sm:$0xf] }
  0xcb   : > { %v1040_v56 = vpop.permute.xlu0 %1039  ;;  %v1050_v57 = vpop.permute.xlu1 %1049  ;;  %v519_v60 = vunpack.c.l.b16 %v476_v52  ;;  %v520_v61 = vunpack.c.h.b16 %v476_v52  ;;  %464 = vst [vmem:[#allocation2 + $0x38] sm:$0xff] %v463_v53 }
  0xcc   : > { %v1042_v62 = vunpack.i.h.bf16 %v1040_v56  ;;  %v1041_v63 = vunpack.i.l.bf16 %v1040_v56  ;;  %v1052_v0 = vunpack.i.h.bf16 %v1050_v57  ;;  %v1051_v1 = vunpack.i.l.bf16 %v1050_v57 }
  0xcd   : > { %v529_v3 = vpack.c.b16 %v519_v60, %v519_v60  ;;  %v530_v4 = vpack.c.b16 %v520_v61, %v520_v61 }
  0xce   : > { %v444_v5 = vsel %vm443_vm4, %v1041_v63, %v1042_v62  ;;  %v445_v6 = vsel %vm443_vm4, %v1042_v62, %v1041_v63  ;;  %v431_v7 = vsel %vm430_vm5, %v1051_v1, %v1052_v0  ;;  %v432_v8 = vsel %vm430_vm5, %v1052_v0, %v1051_v1  ;;  %v893_v1 = vld [vmem:[#allocation2 + $0x10] sm:$0xf] }
  0xcf   : > { %v448_v10 = vmul.f32 %v446_v54, %v444_v5  ;;  %v449_v14 = vmul.f32 %v447_v55, %v445_v6  ;;  %v435_v17 = vmul.f32 %v433_v58, %v431_v7  ;;  %v436_v18 = vmul.f32 %v434_v59, %v432_v8 }
  0xd0   : > { %v545_v19 = vsel %vm543_vm6, %v529_v3, 0  ;;  %v548_v20 = vsel %vm543_vm6, %v530_v4, 0  ;;  %v944_v3 = vld [vmem:[#allocation2 + $0x14] sm:$0xf]  ;;  %v895_v4 = vld [vmem:[#allocation2 + $0x18] sm:$0xf0]  ;;  %v894_v7 = vor.u32 %v945_v2, %v893_v1 }
  0xd1   : > { %v450_v21 = vpack.c.bf16 %v449_v14, %v448_v10  ;;  %v437_v22 = vpack.c.bf16 %v436_v18, %v435_v17  ;;  %553 = vmatpush.bf16.msra.mxu0 %v545_v19  ;;  %566 = vmatpush.bf16.msra.mxu1 %v548_v20  ;;  %v898_v8 = vor.u32 %v944_v3, %v895_v4  ;;  %v478_v18 = vld [vmem:[#allocation9] sm:$0x3]  ;;  %v492_v19 = vpop.permute.xlu2 %491 }
  0xd2   : > { %v949_v49 = vld [vmem:[#allocation2 + $0x34] sm:$0xf0]  ;;  %v911_v56 = vld [vmem:[#allocation2 + $0x38] sm:$0xf0] }
  0xd3   : > { %451 = vst [vmem:[#allocation2 + $0x30] sm:$0xff] %v450_v21  ;;  %v1070_v24 = vpop.permute.xlu1 %1069  ;;  %v1065_v28 = vpop.permute.xlu0 %1064 }
  0xd4   : > { %438 = vst [vmem:[#allocation2 + $0x28] sm:$0xff] %v437_v22  ;;  %v1072_v31 = vunpack.i.h.bf16 %v1070_v24  ;;  %v1071_v32 = vunpack.i.l.bf16 %v1070_v24  ;;  %v1067_v33 = vunpack.i.h.bf16 %v1065_v28  ;;  %v1066_v35 = vunpack.i.l.bf16 %v1065_v28 }
  0xd6   : > { %v392_v37 = vsel %vm391_vm7, %v1071_v32, %v1072_v31  ;;  %v393_v40 = vsel %vm391_vm7, %v1072_v31, %v1071_v32  ;;  %v379_v41 = vsel %vm378_vm8, %v1066_v35, %v1067_v33  ;;  %v380_v42 = vsel %vm378_vm8, %v1067_v33, %v1066_v35 }
  0xd7   : > { %v396_v43 = vmul.f32 %v394_v23, %v393_v40  ;;  %v397_v44 = vmul.f32 %v395_v27, %v392_v37  ;;  %v383_v45 = vmul.f32 %v381_v29, %v380_v42  ;;  %v384_v46 = vmul.f32 %v382_v30, %v379_v41 }
  0xd9   : > { %v398_v47 = vpack.c.bf16 %v397_v44, %v396_v43  ;;  %v385_v48 = vpack.c.bf16 %v384_v46, %v383_v45 }
  0xda   : > { %v909_v52 = vld [vmem:[#allocation2 + $0x30] sm:$0xf]  ;;  %v948_v53 = vld [vmem:[#allocation2 + $0x34] sm:$0xf] }
  0xdb   : > { %399 = vst [vmem:[#allocation2 + $0x8] sm:$0xff] %v398_v47  ;;  %v910_v57 = vor.u32 %v949_v49, %v909_v52  ;;  %v914_v60 = vor.u32 %v948_v53, %v911_v56  ;;  %v947_v61 = vld [vmem:[#allocation2 + $0x24] sm:$0xf0]  ;;  %v903_v62 = vld [vmem:[#allocation2 + $0x28] sm:$0xf0] }
  0xdc   : > { %386 = vst [vmem:[#allocation2] sm:$0xff] %v385_v48  ;;  %v902_v63 = vor.u32 %v947_v61, %v901_v50  ;;  %v906_v0 = vor.u32 %v946_v51, %v903_v62 }
  0xdd   : > { %554 = vmatpush.bf16.msra.mxu0 %v910_v57  ;;  %567 = vmatpush.bf16.msra.mxu1 %v914_v60 }
  0xe1   : > { %555 = vmatpush.bf16.msra.mxu0 %v902_v63  ;;  %568 = vmatpush.bf16.msra.mxu1 %v906_v0 }
  0xe2   : > { %v943_v5 = vld [vmem:[#allocation2 + $0x4] sm:$0xf0]  ;;  %v887_v6 = vld [vmem:[#allocation2 + $0x8] sm:$0xf0] }
  0xe3   : > { %v885_v9 = vld [vmem:[#allocation2] sm:$0xf]  ;;  %v942_v10 = vld [vmem:[#allocation2 + $0x4] sm:$0xf] }
  0xe4   : > { %v886_v14 = vor.u32 %v943_v5, %v885_v9  ;;  %v890_v17 = vor.u32 %v942_v10, %v887_v6 }
  0xe5   : > { %556 = vmatpush.bf16.msra.mxu0 %v894_v7  ;;  %569 = vmatpush.bf16.msra.mxu1 %v898_v8 }
  0xe9   : > { %557 = vmatpush.bf16.msra.mxu0 %v886_v14  ;;  %570 = vmatpush.bf16.msra.mxu1 %v890_v17 }
  0xec   : > { %915 = vmatmul.msk.bf16.vlgmr.msra.gmra.mxu0 %vm539_vm9, %v478_v18  ;;  %916 = vmatmul.msk.bf16.vlgmr.msra.gmra.mxu1 %vm539_vm9, %v478_v18 }
 0x169   : > { %v559_v20 = vpop.f32.mrf.mxu0  ;;  %v572_v21 = vpop.f32.mrf.mxu1 }
 0x16a   : > { %v560_v22 = vadd.f32 %v559_v20, %v492_v19  ;;  %v573_v24 = vadd.f32 %v572_v21, %v492_v19 }
 0x16c   : > { %v576_v28 = vmax.f32 %v560_v22, 0.0  ;;  %v577_v31 = vmax.f32 %v573_v24, 0.0 }
 0x16e   : > { %626 = vrot.lane.b32.xlu2 %v576_v28, %s1248_s14  ;;  %662 = vrot.lane.b32.xlu0 %v576_v28, %s1244_s29  ;;  %v578_v32 = vpack.c.bf16 %v577_v31, %v576_v28 }
 0x16f   : > { %664 = vrot.lane.b32.xlu1 %v577_v31, %s1244_s29  ;;  %s954_s29 = sshll.u32 %s1317_s8, 4  ;;  %s751_s8 = scalar_lea.sflag [#allocation6], %s1393_s30 }
 0x170   : > { %579 = vst [vmem:[#allocation3 + $0x10] sm:$0x33] %v578_v32 }
 0x171   : > { %v561_v33 = vpop.f32.mrf.mxu0  ;;  %v574_v35 = vpop.f32.mrf.mxu1 }
 0x176   : > { %651 = vrot.lane.b32.xlu2 %v577_v31, %s1245_s19  ;;  %628 = vrot.lane.b32.xlu0 %v577_v31, %s1248_s14  ;;  %s342_s14 = scalar_lea.vmem [#allocation10], %s880_s21 }
 0x177   : > { %649 = vrot.lane.b32.xlu1 %v576_v28, %s1245_s19 }
 0x17e   : > { %590 = vrot.lane.b32.xlu2 %v576_v28, %s1250_s28  ;;  %639 = vrot.lane.b32.xlu0 %v576_v28, %s1247_s13 }
 0x17f   : > { %641 = vrot.lane.b32.xlu1 %v577_v31, %s1247_s13  ;;  %s762_s13 = scalar_lea.hbm %s1640_s7, %s954_s29 }
 0x186   : > { %615 = vrot.lane.b32.xlu2 %v577_v31, %s1249_s15  ;;  %592 = vrot.lane.b32.xlu0 %v577_v31, %s1250_s28  ;;  %s766_s28 = sshll.u32 %s762_s13, 4  ;;  %s767_s28 = int_to_ptr.hbm [resolvable:$true] %s766_s28 }
 0x187   : > { %613 = vrot.lane.b32.xlu1 %v576_v28, %s1249_s15  ;;  %s764_s15 = sshll.u32 %s342_s14, 4  ;;  %s765_s15 = int_to_ptr.vmem [resolvable:$true] %s764_s15 }
 0x18e   : > { %603 = vrot.lane.b32.xlu2 %v576_v28, %s1246_s22  ;;  %580 = vrot.lane.b32.xlu0 %v576_v28, %s1251_s16 }
 0x18f   : > { %582 = vrot.lane.b32.xlu1 %v577_v31, %s1251_s16  ;;  %s1182_s16 = sshra.s32 %s767_s28, 4  ;;  %s1183_s16 = int_to_ptr.hbm [resolvable:$true] %s1182_s16 }
 0x190   : > { %s1184_s17 = scalar_lea.hbm %s1183_s16, 16  ;;  %p1189_p7 = scmp.lt.s32.totalorder %s1183_s16, %s1640_s7 }
 0x191   : > { %p1185_p1 = scmp.ne.s32.totalorder %s1183_s16, %s1184_s17  ;;  %p1190_p8 = scmp.lt.s32.totalorder %s1188_s3, %s1184_s17 }
 0x193   : > { %p1186_p5 = pnand %p1185_p1, %p1362_p4  ;;  %p1191_p9 = por %p1190_p8, %p1189_p7 }
 0x195   : > { %p1187_p12 = pneg %p1186_p5 }
 0x196   : > { %605 = vrot.lane.b32.xlu0 %v577_v31, %s1246_s22  ;;  %v678_v31 = vld [vmem:[%s1639_s6] sm:$0xff] }
 0x197   : > { %681 = vperm.xlu1 %1074, %v678_v31   ;;  %p1192_p10 = pnand %p1191_p9, %p1187_p12 }
 0x1c8   : > { %v627_v37 = vpop.permute.xlu2 %626 }
 0x1d0   : > { %v652_v46 = vpop.permute.xlu2 %651 }
 0x1e0   : > { %v663_v40 = vpop.permute.xlu0 %662 }
 0x1e1   : > { %v665_v41 = vpop.permute.xlu1 %664 }
 0x1e2   : > { %v666_v42 = vsel %vm469_vm2, %v663_v40, %v665_v41  ;;  %v667_v43 = vsel %vm469_vm2, %v665_v41, %v663_v40 }
 0x1e3   : > { %v668_v44 = vmul.f32 %v1446_v34, %v666_v42  ;;  %v669_v45 = vmul.f32 %v1449_v36, %v667_v43 }
 0x1e5   : > { %v670_v47 = vpack.c.bf16 %v669_v45, %v668_v44 }
 0x1e7   : > { %671 = vst [vmem:[#allocation3 + $0x20] sm:$0x33] %v670_v47 }
 0x1e8   : > { %v629_v48 = vpop.permute.xlu0 %628 }
 0x1e9   : > { %v630_v49 = vsel %vm430_vm5, %v627_v37, %v629_v48  ;;  %v631_v50 = vsel %vm430_vm5, %v629_v48, %v627_v37  ;;  %v650_v51 = vpop.permute.xlu1 %649 }
 0x1ea   : > { %v632_v52 = vmul.f32 %v630_v49, %v433_v58  ;;  %v633_v53 = vmul.f32 %v631_v50, %v434_v59  ;;  %v653_v34 = vsel %vm456_vm3, %v650_v51, %v652_v46  ;;  %v654_v36 = vsel %vm456_vm3, %v652_v46, %v650_v51  ;;  %v591_v58 = vpop.permute.xlu2 %590 }
 0x1eb   : > { %v655_v56 = vmul.f32 %v653_v34, %v459_v38  ;;  %v656_v57 = vmul.f32 %v654_v36, %v460_v39 }
 0x1ec   : > { %v634_v60 = vpack.c.bf16 %v633_v53, %v632_v52 }
 0x1ed   : > { %v657_v61 = vpack.c.bf16 %v656_v57, %v655_v56 }
 0x1ee   : > { %v636_v62 = vrot.slane %v634_v60, 6  ;;  %v677_v63 = vld [vmem:[#allocation3 + $0x20] sm:$0x33] }
 0x1ef   : > { %v659_v0 = vrot.slane %v657_v61, 6  ;;  %v697_v1 = vunpack.c.l.b16 %v677_v63  ;;  %v698_v59 = vunpack.c.h.b16 %v677_v63 }
 0x1f0   : > { %638 = vst [vmem:[#allocation3 + $0x10] sm:$0xcc] %v636_v62  ;;  %v640_v2 = vpop.permute.xlu0 %639 }
 0x1f1   : > { %661 = vst [vmem:[#allocation3 + $0x18] sm:$0xcc] %v659_v0  ;;  %v642_v3 = vpop.permute.xlu1 %641  ;;  %v703_v4 = vpack.c.b16 %v697_v1, %v697_v1  ;;  %v704_v5 = vpack.c.b16 %v698_v59, %v698_v59 }
 0x1f2   : > { %v643_v38 = vsel %vm443_vm4, %v640_v2, %v642_v3  ;;  %v644_v39 = vsel %vm443_vm4, %v642_v3, %v640_v2  ;;  %v616_v17 = vpop.permute.xlu2 %615 }
 0x1f3   : > { %v645_v6 = vmul.f32 %v643_v38, %v446_v54  ;;  %v646_v7 = vmul.f32 %v644_v39, %v447_v55  ;;  %v715_v8 = vsel %vm713_vm10, %v703_v4, 0  ;;  %v718_v9 = vsel %vm713_vm10, %v704_v5, 0 }
 0x1f4   : > { %725 = vmatpush.bf16.msra.mxu2 %v715_v8  ;;  %738 = vmatpush.bf16.msra.mxu3 %v718_v9 }
 0x1f5   : > { %v647_v10 = vpack.c.bf16 %v646_v7, %v645_v6 }
 0x1f7   : > { %648 = vst [vmem:[#allocation3 + $0x18] sm:$0x33] %v647_v10  ;;  %v952_v33 = vld [vmem:[#allocation3 + $0x14] sm:$0xf] }
 0x1f8   : > { %v593_v14 = vpop.permute.xlu0 %592 }
 0x1f9   : > { %v594_v18 = vsel %vm391_vm7, %v591_v58, %v593_v14  ;;  %v595_v19 = vsel %vm391_vm7, %v593_v14, %v591_v58  ;;  %v614_v20 = vpop.permute.xlu1 %613 }
 0x1fa   : > { %v596_v54 = vmul.f32 %v595_v19, %v394_v23  ;;  %v597_v55 = vmul.f32 %v594_v18, %v395_v27  ;;  %v617_v21 = vsel %vm417_vm1, %v614_v20, %v616_v17  ;;  %v618_v22 = vsel %vm417_vm1, %v616_v17, %v614_v20  ;;  %v927_v27 = vld [vmem:[#allocation3 + $0x10] sm:$0xf]  ;;  %v604_v49 = vpop.permute.xlu2 %603 }
 0x1fb   : > { %v619_v24 = vmul.f32 %v618_v22, %v420_v25  ;;  %v620_v28 = vmul.f32 %v617_v21, %v421_v26 }
 0x1fc   : > { %v598_v23 = vpack.c.bf16 %v597_v55, %v596_v54 }
 0x1fd   : > { %v621_v32 = vpack.c.bf16 %v620_v28, %v619_v24 }
 0x1fe   : > { %v600_v35 = vrot.slane %v598_v23, 6  ;;  %v953_v37 = vld [vmem:[#allocation3 + $0x14] sm:$0xf0]  ;;  %v929_v40 = vld [vmem:[#allocation3 + $0x18] sm:$0xf0] }
 0x1ff   : > { %v623_v41 = vrot.slane %v621_v32, 6  ;;  %v928_v42 = vor.u32 %v953_v37, %v927_v27  ;;  %v932_v43 = vor.u32 %v952_v33, %v929_v40 }
 0x200   : > { %602 = vst [vmem:[#allocation3] sm:$0xcc] %v600_v35  ;;  %v581_v25 = vpop.permute.xlu0 %580 }
 0x201   : > { %625 = vst [vmem:[#allocation3 + $0x8] sm:$0xcc] %v623_v41  ;;  %v583_v44 = vpop.permute.xlu1 %582  ;;  %726 = vmatpush.bf16.msra.mxu2 %v928_v42  ;;  %739 = vmatpush.bf16.msra.mxu3 %v932_v43 }
 0x202   : > { %v584_v26 = vsel %vm378_vm8, %v581_v25, %v583_v44  ;;  %v585_v45 = vsel %vm378_vm8, %v583_v44, %v581_v25 }
 0x203   : > { %v586_v46 = vmul.f32 %v585_v45, %v381_v29  ;;  %v587_v47 = vmul.f32 %v584_v26, %v382_v30 }
 0x205   : > { %v588_v48 = vpack.c.bf16 %v587_v47, %v586_v46 }
 0x207   : > { %589 = vst [vmem:[#allocation3] sm:$0x33] %v588_v48 }
 0x208   : > { %v606_v50 = vpop.permute.xlu0 %605 }
 0x209   : > { %v607_v51 = vsel %vm404_vm0, %v604_v49, %v606_v50  ;;  %v608_v52 = vsel %vm404_vm0, %v606_v50, %v604_v49  ;;  %v682_v12 = vpop.permute.xlu1 %681 }
 0x20a   : > { %v609_v53 = vmul.f32 %v608_v52, %v407_v15  ;;  %v610_v29 = vmul.f32 %v607_v51, %v408_v16 }
 0x20c   : > { %v611_v34 = vpack.c.bf16 %v610_v29, %v609_v53 }
 0x20e   : > { %612 = vst [vmem:[#allocation3 + $0x8] sm:$0x33] %v611_v34  ;;  %v919_v30 = vld [vmem:[#allocation3] sm:$0xf]  ;;  %v950_v56 = vld [vmem:[#allocation3 + $0x4] sm:$0xf] }
 0x215   : > { %v951_v36 = vld [vmem:[#allocation3 + $0x4] sm:$0xf0]  ;;  %v921_v57 = vld [vmem:[#allocation3 + $0x8] sm:$0xf0] }
 0x216   : > { %v920_v60 = vor.u32 %v951_v36, %v919_v30  ;;  %v924_v61 = vor.u32 %v950_v56, %v921_v57 }
 0x218   : > { %727 = vmatpush.bf16.msra.mxu2 %v920_v60  ;;  %740 = vmatpush.bf16.msra.mxu3 %v924_v61 }
 0x21b   : > { %933 = vmatmul.msk.bf16.vlgmr.msra.gmra.mxu2 %vm709_vm11, %v672_v11  ;;  %934 = vmatmul.msk.bf16.vlgmr.msra.gmra.mxu3 %vm709_vm11, %v672_v11 }
 0x29e   : > { %v729_v13 = vpop.f32.mrf.mxu2  ;;  %v742_v15 = vpop.f32.mrf.mxu3 }
 0x29f   : > { %v730_v16 = vadd.f32 %v729_v13, %v682_v12  ;;  %v743_v62 = vadd.f32 %v742_v15, %v682_v12 }
 0x2a1   : > { %v746_v63 = vmax.f32 %v730_v16, 0.0  ;;  %v747_v58 = vmax.f32 %v743_v62, 0.0 }
 0x2a3   : > { %748 = vst [vmem:[%s342_s14] sm:$0xff] %v746_v63 }
 0x2a4   : > { %749 = vst [vmem:[%s342_s14 + $0x8] sm:$0xff] %v747_v58 }
 0x2a5   : > { %1195 = shalt.err (!%p1192_p10)
}
 0x2a6   : > { %965 = dma.vmem_to_hbm [thread:$0]  (%p1362_p4), %s765_s15, 256, %s767_s28, %s751_s8   ;;  %v731_v0 = vpop.f32.mrf.mxu2  ;;  %v744_v1 = vpop.f32.mrf.mxu3 }
 0x2a7 PF: > { %s778_s30 = sand.u32 1, %s1226_s24   ;;  %p1651_p13 = scmp.ge.s32.totalorder %s1238_s27, 2 }
 0x2a8   : > { %s779_s21 = scalar_lea.sflag [#allocation6], %s778_s30 }
 0x2a9   : > { %p979_p11 = pnand %p1651_p13, %p1366_p6 }
 0x2ab   : > { %p980_p0 = pneg %p979_p11 }
 0x2ad   : > { %1221 = dma.done.wait (%p980_p0), %s779_s21, 256  }
 0x2ae   : > { %1223 = vsyncadd (%p980_p0), %s779_s21, 4294967040  ;;  %p21_p4 = scmp.ge.s32.totalorder %s1336_s20, 4   ;;  %s1652_s24 = smov %s1230_s25 }
 0x2af   : > { %s1653_s25 = smov %s1234_s26  ;;  %s1654_s26 = smov %s1347_s23 }
 0x2b0   : > { %s1655_s27 = smov %s1336_s20  ;;  %23 = sbr.rel (!%p21_p4) target bundleno = 9 (0x9), region = 105 }
 0x2b5   :  { %785 = vsyncpa [#allocation5], 1 }
 0x2b6   :  { %787 = vsyncpa [#allocation5 + $0x1], 1 }
 0x2b7   :  { %788 = vsyncpa [#allocation8], 1 }
 0x2b8   :  { %789 = vsyncpa [#allocation6], 1 }
 0x2b9   :  { %791 = vsyncpa [#allocation6 + $0x1], 1 }

</bundles_post_ra>
